<compile_context>
chip_gen: v7x
topology: tpu7x:2x2x1
jax: 0.10.0
libtpu: 0.0.40
codegen_flags: <defaults>
</compile_context>

<pallas_src>
import functools
import math

import jax
import jax.numpy as jnp
import numpy as np
from jax.experimental import pallas as pl
from jax.experimental.pallas import tpu as pltpu


# ------------------------------- small helpers -------------------------------
def _round_up(x, m):
    return ((x + m - 1) // m) * m


def _required_kernel(output_size, kernel, stride):
    # mirrors DTCDecoder._calcuate_required_kernel
    while (output_size + stride - kernel) % stride != 0:
        kernel -= 1
    return kernel


# -------------------------------- Pallas kernel ------------------------------
def _dtc_kernel(x_ref, a_ref, o_ref, *, bias):
    # x_ref: (1, TILE_M, BAND)  input-row band for this (col-tile, row-tile)
    # a_ref: (1, BAND, TILE_N)  folded upsample+deconv coefficients for this col-tile
    # o_ref: (TILE_M, TILE_N)
    y = jnp.dot(x_ref[0], a_ref[0], preferred_element_type=jnp.float32) + bias
    # F.leaky_relu, negative_slope=0.01  (max(y, 0.01*y) since slope < 1)
    o_ref[...] = jnp.maximum(y, 0.01 * y).astype(o_ref.dtype)


def _dtc_matmul(x_bands, a_bands, *, bias, tile_m):
    # x_bands: (n_tiles, N_pad, BAND), a_bands: (n_tiles, BAND, TILE_N)
    n_tiles, n_pad, band = x_bands.shape
    tile_n = a_bands.shape[2]
    l_out_pad = n_tiles * tile_n
    # Column tiles OUTER, row tiles INNER: the (BAND, TILE_N) coefficient block keeps
    # the same block index across the inner row loop (no redundant re-DMA); only the
    # small (TILE_M, BAND) activation tile changes per step.
    grid = (n_tiles, n_pad // tile_m)
    # VMEM/step: (tile_m*band + band*tile_n + tile_m*tile_n)*4B double-buffered —
    # well under the v7x 64 MiB physical / 32 MiB default scoped-VMEM limit.
    return pl.pallas_call(
        functools.partial(_dtc_kernel, bias=bias),
        out_shape=jax.ShapeDtypeStruct((n_pad, l_out_pad), jnp.float32),
        grid=grid,
        in_specs=[
            pl.BlockSpec((1, tile_m, band), lambda j, i: (j, i, 0)),
            pl.BlockSpec((1, band, tile_n), lambda j, i: (j, 0, 0)),
        ],
        out_specs=pl.BlockSpec((tile_m, tile_n), lambda j, i: (i, j)),
        compiler_params=pltpu.CompilerParams(
            dimension_semantics=("parallel", "parallel")),
    )(x_bands, a_bands)


# ------------------------------- module wrapper -------------------------------
class DTCDecoderPallas:
    """Pallas TPU forward for DTCDecoder: upsample -> ConvTranspose1d(1,1,K,S) -> leaky_relu."""

    def __init__(self, output_size, deconv_kernel, deconv_stride, *, key,
                 tile_m=128, tile_n=512):
        self.output_size = int(output_size)
        self.stride = int(deconv_stride)
        self.kernel = _required_kernel(self.output_size, int(deconv_kernel), self.stride)
        self.upsample = (self.output_size + self.stride - self.kernel) // self.stride
        self.tile_m = int(tile_m)
        self.tile_n = int(tile_n)

        # deterministic ConvTranspose1d(1, 1, K) init (PyTorch-style uniform bound)
        bound = 1.0 / math.sqrt(self.kernel)
        kw, kb = jax.random.split(key)
        self.W = jax.random.uniform(kw, (self.kernel,), jnp.float32, -bound, bound)
        self.b = jax.random.uniform(kb, (1,), jnp.float32, -bound, bound)
        self._bias = float(self.b[0])          # baked into the kernel epilogue

        self._plan_cache = {}                  # L_in -> (a_bands, band_offsets, band, tile_n)
        self._fwd = jax.jit(self._forward, static_argnames=("band_offsets",))

    # ---- host-side, computed once per L_in and cached: banded folded matrix ----
    def _plan(self, l_in):
        if l_in in self._plan_cache:
            return self._plan_cache[l_in]
        L_up, K, S, L_out = self.upsample, self.kernel, self.stride, self.output_size
        W = np.asarray(self.W, np.float64)

        # integer nearest-neighbour source index (matches PyTorch 'nearest')
        src = (np.arange(L_up) * l_in) // L_up
        # dense folded matrix (host only, never shipped whole to the device)
        A = np.zeros((l_in, L_out), np.float64)
        for i in range(L_up):
            A[src[i], i * S:i * S + K] += W

        tile_n = min(self.tile_n, _round_up(L_out, 128))
        l_out_pad = _round_up(L_out, tile_n)
        if l_out_pad > L_out:
            A = np.pad(A, ((0, 0), (0, l_out_pad - L_out)))
        n_tiles = l_out_pad // tile_n

        # contributing input-row band per output column tile
        los, widths = [], []
        for j in range(n_tiles):
            nz = np.nonzero(np.abs(A[:, j * tile_n:(j + 1) * tile_n]).sum(axis=1) > 0)[0]
            lo = int(nz[0]) if nz.size else 0
            hi = int(nz[-1]) + 1 if nz.size else 1
            los.append(lo)
            widths.append(hi - lo)
        band = min(_round_up(max(widths), 8), l_in)
        los = [min(lo, l_in - band) for lo in los]      # keep slices in-bounds
        a_bands = np.stack([A[lo:lo + band, j * tile_n:(j + 1) * tile_n]
                            for j, lo in enumerate(los)])

        plan = (jnp.asarray(a_bands, jnp.float32), tuple(los), band, tile_n)
        self._plan_cache[l_in] = plan
        return plan

    # ---- jitted forward: band gather (tiny input) + Pallas matmul + epilogue ----
    def _forward(self, x, a_bands, band_offsets):
        n, _, l_in = x.shape
        _, band, _ = a_bands.shape

        tile_m = min(self.tile_m, _round_up(n, 8))
        n_pad = _round_up(n, tile_m)

        x2d = x.reshape(n, l_in).astype(jnp.float32)
        if n_pad != n:
            x2d = jnp.pad(x2d, ((0, n_pad - n), (0, 0)))

        # static (trace-time) band gather of the small input: (n_tiles, N_pad, BAND)
        x_bands = jnp.stack([x2d[:, lo:lo + band] for lo in band_offsets])

        y = _dtc_matmul(x_bands, a_bands, bias=self._bias, tile_m=tile_m)
        return y[:n, :self.output_size].reshape(n, 1, self.output_size)

    def __call__(self, x):
        assert x.ndim == 3 and x.shape[1] == 1, "DTCDecoder expects (N, 1, L_in)"
        a_bands, band_offsets, _, _ = self._plan(int(x.shape[-1]))
        return self._fwd(x, a_bands, band_offsets=band_offsets)


# ---------------------------------- reference ---------------------------------
def ref_forward(x, W, b, L_up, K, S, L_out):
    x = np.asarray(x, np.float64)
    W = np.asarray(W, np.float64)
    N, _, L_in = x.shape
    src = (np.arange(L_up) * L_in) // L_up          # same integer 'nearest' formula
    xu = x[:, 0, :][:, src]                         # (N, L_up)
    y = np.zeros((N, L_out), np.float64)
    for i in range(L_up):
        y[:, i * S:i * S + K] += xu[:, i:i + 1] * W
    y += float(np.asarray(b)[0])
    y = np.where(y >= 0.0, y, 0.01 * y)
    return y.reshape(N, 1, L_out)


# ------------------------------------ main -------------------------------------
if __name__ == "__main__":
    key = jax.random.PRNGKey(0)
    kparam, kx = jax.random.split(key)

    # Small shapes consistent with the module: x is (N, 1, L_in); output_size large
    # enough (1024) to exercise two lane-dense column tiles with distinct input bands.
    output_size, deconv_kernel, deconv_stride = 1024, 8, 4
    N, L_in = 8, 32

    dec = DTCDecoderPallas(output_size, deconv_kernel, deconv_stride, key=kparam)
    x = jax.random.normal(kx, (N, 1, L_in), dtype=jnp.float32)

    y = dec(x)
    jax.block_until_ready(y)
    assert y.shape == (N, 1, output_size), y.shape

    y_ref = ref_forward(np.asarray(x), np.asarray(dec.W), np.asarray(dec.b),
                        dec.upsample, dec.kernel, dec.stride, output_size)
    np.testing.assert_allclose(np.asarray(y), y_ref, rtol=1e-4, atol=1e-4)

    # second call: hits the cached plan + compiled executable (no rebuild / retrace)
    y2 = dec(x)
    jax.block_until_ready(y2)

    print("KERNEL_OK")
</pallas_src>

<mosaic_0001>
module attributes {stable_mosaic.version = 11 : i64} {
  func.func @_dtc_kernel(%arg0: i32, %arg1: i32, %arg2: memref<1x8x24xf32, #tpu.memory_space<vmem>>, %arg3: memref<1x24x512xf32, #tpu.memory_space<vmem>>, %arg4: memref<8x512xf32, #tpu.memory_space<vmem>>) attributes {dimension_semantics = [#tpu.dimension_semantics<parallel>, #tpu.dimension_semantics<parallel>], iteration_bounds = array<i64: 2, 1>, scalar_prefetch = 0 : i64, scratch_operands = 0 : i64, tpu.core_type = #tpu.core_type<tc>, window_params = [{transform_indices = @transform_0, window_bounds = array<i64: 1, 8, 24>}, {transform_indices = @transform_1, window_bounds = array<i64: 1, 24, 512>}, {transform_indices = @transform_2, window_bounds = array<i64: 8, 512>}]} {
    %c0 = arith.constant 0 : index
    %c0_0 = arith.constant 0 : index
    %c0_1 = arith.constant 0 : index
    %0 = vector.load %arg2[%c0, %c0_0, %c0_1] : memref<1x8x24xf32, #tpu.memory_space<vmem>>, vector<1x8x24xf32>
    %1 = vector.shape_cast %0 : vector<1x8x24xf32> to vector<8x24xf32>
    %c0_2 = arith.constant 0 : index
    %c0_3 = arith.constant 0 : index
    %c0_4 = arith.constant 0 : index
    %2 = vector.load %arg3[%c0_2, %c0_3, %c0_4] : memref<1x24x512xf32, #tpu.memory_space<vmem>>, vector<1x24x512xf32>
    %3 = vector.shape_cast %2 : vector<1x24x512xf32> to vector<24x512xf32>
    %cst = arith.constant dense<0.000000e+00> : vector<8x512xf32>
    %4 = tpu.matmul %1, %3, %cst {dimension_numbers = #tpu.dot_dimension_numbers<[1], [0], [0], [1], [0, 0, 1, 1], [], []>} : vector<8x24xf32>, vector<24x512xf32>, vector<8x512xf32> -> vector<8x512xf32>
    %cst_5 = arith.constant -0.279808968 : f32
    %5 = vector.broadcast %cst_5 : f32 to vector<8x512xf32>
    %6 = arith.addf %4, %5 : vector<8x512xf32>
    %cst_6 = arith.constant 0.00999999977 : f32
    %7 = vector.broadcast %cst_6 : f32 to vector<8x512xf32>
    %8 = arith.mulf %7, %6 : vector<8x512xf32>
    %9 = arith.maximumf %6, %8 : vector<8x512xf32>
    %c0_7 = arith.constant 0 : index
    %c0_8 = arith.constant 0 : index
    %10 = vector.load %arg4[%c0_7, %c0_8] : memref<8x512xf32, #tpu.memory_space<vmem>>, vector<8x512xf32>
    tpu.vector_store %arg4[%c0_7, %c0_8], %9 {strides = array<i32>} : memref<8x512xf32, #tpu.memory_space<vmem>>, vector<8x512xf32>,
    return
  }
  func.func @transform_0(%arg0: i32, %arg1: i32) -> (i32, i32, i32) {
    %c0_i32 = arith.constant 0 : i32
    %c0_i32_0 = arith.constant 0 : i32
    return %arg0, %arg1, %c0_i32 : i32, i32, i32
  }
  func.func @transform_1(%arg0: i32, %arg1: i32) -> (i32, i32, i32) {
    %c0_i32 = arith.constant 0 : i32
    %c0_i32_0 = arith.constant 0 : i32
    %c0_i32_1 = arith.constant 0 : i32
    return %arg0, %c0_i32, %c0_i32_0 : i32, i32, i32
  }
  func.func @transform_2(%arg0: i32, %arg1: i32) -> (i32, i32) {
    %c0_i32 = arith.constant 0 : i32
    return %arg1, %arg0 : i32, i32
  }
}

</mosaic_0001>

<bundles_post_ra>
// kernel: _forward.1
= control target key start
LH: loop header
LB: loop body
LE: loop exit
PB: predicated region body
PF: predicated region fallthrough
CT: control target
= control target key end

     0   :  { %7 = vsyncpa [#allocation3], 0  ;;  %s812_s0 = inlined_call_operand.vmem [shape: f32[2,8,24], index: 0, kind: input, shape index: {}]   ;;  %s813_s1 = inlined_call_operand.hbm [shape: f32[2,24,512], index: 1, kind: input, shape index: {}]   ;;  %s814_s2 = inlined_call_operand.vmem [shape: f32[8,1024], index: 2, kind: output, shape index: {}]  }
   0x1   :  { %9 = vsyncpa [#allocation3 + $0x1], 0  ;;  %s676_s9 = smov 0   ;;  %s678_s10 = smov 0  }
   0x2   :  { %s680_s11 = smov 0   ;;  %s682_s12 = smov 0  }
   0x3   :  { %s684_s13 = smov 0   ;;  %s686_s14 = smov 0  }
   0x4 LB: > { %s493_s15 = sadd.s32 4294967295, %s655_s14   ;;  %s27_s16 = sadd.s32 1, %s651_s13  ;;  %s655_s14 = sphi %s686_s14, %s15_s14   ;;  %s651_s13 = sphi %s684_s13, %s821_s13   ;;  %s647_s12 = sphi %s682_s12, %s820_s12   ;;  %s643_s11 = sphi %s680_s11, %s819_s11   ;;  %s639_s10 = sphi %s678_s10, %s818_s10   ;;  %s635_s9 = sphi %s676_s9, %s817_s9  }
   0x5   : > { %p29_p0 = scmp.ge.s32.totalorder %s27_s16, 2  ;;  %s62_s17 = sadd.s32 1, %s643_s11 }
   0x6   : > { %p69_p1 = scmp.ne.s32.totalorder %s643_s11, %s639_s10  ;;  %p70_p2 = scmp.eq.s32.totalorder %s655_s14, 0 }
   0x7   : > { %s823_s16 = smov (%p29_p0, %s27_s16), 0  ;;  %p75_p4 = scmp.ne.s32.totalorder %s639_s10, %s635_s9 }
   0x8   : > { %p71_p3 = por %p70_p2, %p69_p1  ;;  %s59_s18 = ssub.s32 %s651_s13, %s823_s16 }
   0x9   : > { %p76_p5 = scmp.eq.s32.totalorder %s493_s15, 0  ;;  %p60_p6 = scmp.eq.s32.totalorder %s59_s18, 0 }
   0xa   : > { %p523_p8 = scmp.lt.s32.totalorder %s655_s14, 2  ;;  %s137_s21 = sand.u32 1, %s643_s11  }
   0xb   : > { %p715_p7 = por %p76_p5, %p75_p4  ;;  %s515_s22 = smul.u32 1536, %s651_s13 }
   0xc   : > { %s721_s20 = scalar_select %p60_p6, %s643_s11, %s62_s17  }
   0xd   : > { %s514_s23 = smul.u32 96, %s137_s21  ;;  %s728_s26 = scalar_lea.hbm %s813_s1, %s515_s22 }
   0xe   : > { %p730_p9 = pnand %p523_p8, %p71_p3  ;;  %s736_s30 = scalar_lea.sflag [#allocation3], %s137_s21 }
   0xf   : > { %s141_s28 = scalar_lea.vmem [#allocation2], %s514_s23  ;;  %s575_s3 = scalar_lea.hbm %s728_s26, 1536 }
  0x10   : > { %s148_s29 = sshll.u32 %s141_s28, 4  ;;  %p576_p10 = scmp.ne.s32.totalorder %s728_s26, %s575_s3  ;;  %s734_s29 = int_to_ptr.vmem [resolvable:$true] %s148_s29 }
  0x11   : > { %p577_p11 = pneg %p730_p9  ;;  %s580_s6 = scalar_lea.hbm %s813_s1, 3072 }
  0x12   : > { %p581_p0 = scmp.lt.u32.totalorder %s728_s26, %s813_s1  ;;  %p582_p1 = scmp.lt.u32.totalorder %s580_s6, %s575_s3 }
  0x13   : > { %p578_p12 = pnand %p577_p11, %p576_p10  ;;  %p584_p3 = scmp.lt.u32.totalorder %s575_s3, %s728_s26 }
  0x14   : > { %p583_p2 = por %p582_p1, %p581_p0 }
  0x15   : > { %p579_p13 = pneg %p578_p12 }
  0x16   : > { %p585_p4 = por %p584_p3, %p583_p2 }
  0x18   : > { %p586_p5 = pnand %p585_p4, %p579_p13 }
  0x1a   : > { %589 = shalt.err (!%p586_p5)
}
  0x1b   : > { %s590_s9 = scalar_lea.vmem %s734_s29, 1536  ;;  %s657_s15 = smov [#allocation2]  }
  0x1c   : > { %p591_p6 = scmp.ne.s32.totalorder %s734_s29, %s590_s9  ;;  %s595_s17 = sshll.u32 %s657_s15, 4  ;;  %s596_s17 = int_to_ptr.vmem [resolvable:$false] %s595_s17 }
  0x1d   : > { %s597_s18 = scalar_lea.vmem %s596_s17, 3072  ;;  %p598_p12 = scmp.lt.s32.totalorder %s734_s29, %s596_s17 }
  0x1e   : > { %p593_p8 = pnand %p591_p6, %p577_p11  ;;  %p599_p0 = scmp.lt.s32.totalorder %s597_s18, %s590_s9 }
  0x20   : > { %p594_p10 = pneg %p593_p8  ;;  %p600_p1 = por %p599_p0, %p598_p12 }
  0x22   : > { %p601_p2 = pnand %p600_p1, %p594_p10 }
  0x24   : > { %604 = shalt.err (!%p601_p2)
}
  0x25   : > { %s658_s21 = smov 512   ;;  %s659_s22 = smov 32  }
  0x26   : > { %522 = dma.hbm_to_vmem [thread:$0]  (!%p730_p9), %s728_s26, 1536, %s734_s29, %s736_s30, %s658_s21, %s658_s21, %s659_s22  }
  0x27   : > { %p498_p11 = scmp.ge.s32.totalorder %s655_s14, 1  ;;  %p156_p13 = scmp.lt.s32.totalorder %s655_s14, 3 }
  0x29   : > { %p157_p3 = pnand %p498_p11, %p156_p13 }
  0x2a   : > { %s162_s23 = sand.u32 (!%p157_p3), 1, %s639_s10  }
  0x2b   : > { %160 = sbr.rel (%p157_p3) target bundleno = 282 (0x11a), region = 28  ;;  %s163_s25 = scalar_lea.sflag (!%p157_p3), [#allocation3], %s162_s23 }
  0x2c   : > { %s516_s24 = smul.u32 (!%p157_p3), 96, %s162_s23 }
  0x2e   : > { %s767_s28 = scalar_lea.vmem (!%p157_p3), [#allocation2], %s516_s24 }
  0x32   : > { %630 = dma.done.wait (%p715_p7), %s163_s25, 1536  }
  0x33   : > { %632 = vsyncadd (%p715_p7), %s163_s25, 4294965760  ;;  %p198_p9 = scmp.lt.s32.totalorder %s647_s12, 1  ;;  %v660_v0 = vmov 0.0   ;;  %v217_v1 = vld [vmem:[%s767_s28 + $0x8] sm:$0xff]  ;;  %v219_v3 = vld [vmem:[%s767_s28 + $0x18] sm:$0xff]  ;;  %vm228_vm0 = vcmask 195584  }
  0x34   : > { %296 = vmatprep.mubr.f32.mxu0 %v660_v0  ;;  %367 = vmatprep.mubr.f32.mxu1 %v660_v0  ;;  %v221_v2 = vld [vmem:[%s767_s28 + $0x28] sm:$0xff]  ;;  %v223_v5 = vld [vmem:[%s767_s28 + $0x38] sm:$0xff]  ;;  %v216_v6 = vld [vmem:[%s767_s28] sm:$0xff]  ;;  %s500_s3 = sshll.u32 %s647_s12, 2 }
  0x35   : > { %s199_s26 = scalar_select %p198_p9, %s647_s12, 1  ;;  %v506_v4 = vpack.c.bf16 %v221_v2, %v217_v1  ;;  %v220_v7 = vld [vmem:[%s767_s28 + $0x20] sm:$0xff]  ;;  %v510_v8 = vpack.c.bf16 %v223_v5, %v219_v3  ;;  %v218_v10 = vld [vmem:[%s767_s28 + $0x10] sm:$0xff]  ;;  %v225_v12 = vld [vmem:[%s767_s28 + $0x48] sm:$0xff] }
  0x36   : > { %v508_v9 = vpack.c.bf16 %v220_v7, %v216_v6  ;;  %v222_v11 = vld [vmem:[%s767_s28 + $0x30] sm:$0xff]  ;;  %v227_v14 = vld [vmem:[%s767_s28 + $0x58] sm:$0xff]  ;;  %v224_v15 = vld [vmem:[%s767_s28 + $0x40] sm:$0xff]  ;;  %p208_p7 = scmp.lt.s32.totalorder %s500_s3, 7 }
  0x37   : > { %s499_s19 = sshll.u32 %s199_s26, 3  ;;  %507 = vmatprep.subr.bf16.mxu0 %v506_v4  ;;  %v512_v13 = vpack.c.bf16 %v222_v11, %v218_v10  ;;  %511 = vmatprep.subr.bf16.mxu1 %v510_v8  ;;  %v226_v16 = vld [vmem:[%s767_s28 + $0x50] sm:$0xff] }
  0x38   : > { %s204_s30 = scalar_lea.vmem %s812_s0, %s499_s19  ;;  %509 = vmatpush1.bf16.msra.mxu0 %v508_v9  ;;  %s825_s3 = smov (!%p208_p7, %s500_s3), 7 }
  0x39   : > { %513 = vmatpush1.bf16.msra.mxu1 %v512_v13  ;;  %236 = vmatprep.subr.mxu0 %v225_v12  ;;  %v215_v17 = vld [vmem:[%s204_s30] sm:$0xff]  ;;  %s501_s4 = sshll.u32 %s825_s3, 3 }
  0x3a   : > { %307 = vmatprep.subr.mxu1 %v227_v14  ;;  %s213_s7 = scalar_lea.vmem %s814_s2, %s501_s4 }
  0x3c   : > { %237 = vmatpush1.msra.mxu0 %v224_v15 }
  0x3d   : > { %308 = vmatpush1.msra.mxu1 %v226_v16  ;;  %502 = vmatmul.mubr.msk.f32.vlgmr.msra.gmra.mrb[0].mxu0 %vm228_vm0, %v215_v17 }
  0x3e   : > { %503 = vmatmul.mubr.msk.f32.vlgmr.msra.gmra.mrb[0].mxu1 %vm228_vm0, %v215_v17 }
 0x110   : > { %v298_v18 = vpop.f32.mrb[0].mxu0 }
 0x111   : > { %v299_v19 = vadd.f32 -0.27980897, %v298_v18  ;;  %v369_v20 = vpop.f32.mrb[0].mxu1  ;;  %v300_v21 = vpop.f32.mrb[1].mxu0 }
 0x112   : > { %v370_v22 = vadd.f32 -0.27980897, %v369_v20  ;;  %v301_v23 = vadd.f32 -0.27980897, %v300_v21  ;;  %v371_v24 = vpop.f32.mrb[1].mxu1 }
 0x113   : > { %v374_v25 = vmul.f32 0.01, %v299_v19  ;;  %v372_v26 = vadd.f32 -0.27980897, %v371_v24 }
 0x114   : > { %v376_v27 = vmul.f32 0.01, %v370_v22  ;;  %v375_v28 = vmul.f32 0.01, %v301_v23 }
 0x115   : > { %v378_v29 = vmax.f32 %v299_v19, %v374_v25  ;;  %v377_v30 = vmul.f32 0.01, %v372_v26 }
 0x116   : > { %v379_v31 = vmax.f32 %v301_v23, %v375_v28  ;;  %v380_v32 = vmax.f32 %v370_v22, %v376_v27 }
 0x117   : > { %382 = vst [vmem:[%s213_s7] sm:$0xff] %v378_v29  ;;  %v381_v33 = vmax.f32 %v372_v26, %v377_v30 }
 0x118   : > { %383 = vst [vmem:[%s213_s7 + $0x8] sm:$0xff] %v379_v31  ;;  %384 = vst [vmem:[%s213_s7 + $0x10] sm:$0xff] %v380_v32 }
 0x119   : > { %385 = vst [vmem:[%s213_s7 + $0x18] sm:$0xff] %v381_v33 }
 0x11a PF: > { %s15_s14 = sadd.s32 1, %s655_s14   ;;  %s817_s9 = smov %s639_s10 }
 0x11b   : > { %p12_p4 = scmp.ge.s32.totalorder %s15_s14, 4   ;;  %s818_s10 = smov %s643_s11 }
 0x11c   : > { %s819_s11 = smov %s721_s20  ;;  %s820_s12 = smov %s651_s13 }
 0x11d   : > { %s821_s13 = smov %s823_s16  ;;  %14 = sbr.rel (!%p12_p4) target bundleno = 4 (0x4), region = 71 }
 0x124   :  { %416 = vsyncpa [#allocation3], 1 }
 0x125   :  { %418 = vsyncpa [#allocation3 + $0x1], 1 }

</bundles_post_ra>
